<compile_context>
chip_gen: v7x
topology: tpu7x:2x2x1
jax: 0.10.0
libtpu: 0.0.40
codegen_flags: <defaults>
</compile_context>

<pallas_src>
import functools

import jax
import jax.numpy as jnp
from jax.experimental import pallas as pl
from jax.experimental.pallas import tpu as pltpu


def _round_up(n, m):
    return ((n + m - 1) // m) * m


def mlp_kernel(x_ref, w1_ref, b1_ref, w2_ref, b2_ref, w3_ref, b3_ref, out_ref):
    # x arrives in its original dtype (f32); cast to the MXU operand dtype
    # in-kernel so the wrapper never materializes a padded/cast copy of x.
    x = x_ref[...].astype(w1_ref.dtype)

    # Layer 1: (TB, K) @ (K, 128) + (1, 128) -> ReLU     (bf16 MXU, f32 acc)
    h1 = jnp.dot(x, w1_ref[...], preferred_element_type=jnp.float32)
    h1 = jnp.maximum(h1 + b1_ref[...], 0.0)

    # Dropout(0.3): identity at inference.

    # Layer 2: (TB, 128) @ (128, 128) + (1, 128) -> ReLU
    # (bias-add/ReLU kept in f32 for v5e; on v6e/v7x bf16 here is a minor win)
    h2 = jnp.dot(h1.astype(w2_ref.dtype), w2_ref[...],
                 preferred_element_type=jnp.float32)
    h2 = jnp.maximum(h2 + b2_ref[...], 0.0)

    # Dropout(0.2): identity at inference.

    # Layer 3: (TB, 128) @ (128, Cp) + (1, Cp)   (lane-dense Cp=128 store)
    logits = jnp.dot(h2.astype(w3_ref.dtype), w3_ref[...],
                     preferred_element_type=jnp.float32)
    out_ref[...] = (logits + b3_ref[...]).astype(out_ref.dtype)


def prepare_params(params, *, compute_dtype=jnp.bfloat16):
    """One-time pad + cast of weights/biases (hoisted out of the per-call path).

    Weights are (in_features, out_features), biases (out_features,) or
    (1, out_features).  Only *output*-feature widths are zero-padded to
    lane-dense multiples of 128 (H2: 64->128, classes: C->128); the
    contraction dim K is left unpadded.  Returns (prepared_dict, num_classes).
    """
    w1, b1 = params["w1"], params["b1"]
    w2, b2 = params["w2"], params["b2"]
    w3, b3 = params["w3"], params["b3"]
    K, H1 = w1.shape
    H2 = w2.shape[1]
    C = w3.shape[1]
    H1p, H2p, Cp = _round_up(H1, 128), _round_up(H2, 128), _round_up(C, 128)

    def pad_w(w, rows, cols):
        return (jnp.zeros((rows, cols), compute_dtype)
                .at[:w.shape[0], :w.shape[1]].set(w.astype(compute_dtype)))

    def pad_b(b, cols):
        b = b.astype(jnp.float32).reshape(1, -1)
        return jnp.zeros((1, cols), jnp.float32).at[:, :b.shape[1]].set(b)

    prepared = {
        "w1": pad_w(w1, K, H1p), "b1": pad_b(b1, H1p),
        "w2": pad_w(w2, H1p, H2p), "b2": pad_b(b2, H2p),
        "w3": pad_w(w3, H2p, Cp), "b3": pad_b(b3, Cp),
    }
    return prepared, C


@functools.partial(jax.jit,
                   static_argnames=("num_classes", "block_batch", "out_dtype"))
def first_letter_mlp_forward(x, prepared, *, num_classes, block_batch=2048,
                             out_dtype=jnp.bfloat16):
    """x: (B, input_dim) float32 (or bf16).  prepared: output of prepare_params."""
    w1, b1 = prepared["w1"], prepared["b1"]
    w2, b2 = prepared["w2"], prepared["b2"]
    w3, b3 = prepared["w3"], prepared["b3"]

    B, K = x.shape
    assert w1.shape[0] == K, "input_dim mismatch with prepared params"
    H1p = w1.shape[1]
    H2p = w2.shape[1]
    Cp = w3.shape[1]

    # Batch tile: multiple of 8 sublanes, big enough to amortize per-step grid
    # overhead.  B is NOT padded — the grid uses partial boundary blocks; OOB
    # output rows are dropped, so tail-padding traffic is never paid.  When B
    # is large enough, cap TB so there are >= 2 grid steps (v7x megacore).
    TB = _round_up(min(block_batch, max(B, 8)), 8)
    if B >= 16:
        TB = min(TB, _round_up(pl.cdiv(B, 2), 8))
    grid = (pl.cdiv(B, TB),)

    tiled = lambda shape: pl.BlockSpec(shape, lambda i: (i, 0))     # per-step tile
    resident = lambda shape: pl.BlockSpec(shape, lambda i: (0, 0))  # VMEM-resident

    itemsize = lambda d: jnp.dtype(d).itemsize
    weight_bytes = sum(int(a.size) * itemsize(a.dtype)
                       for a in (w1, b1, w2, b2, w3, b3))
    cost = pl.CostEstimate(
        flops=2 * B * (K * H1p + H1p * H2p + H2p * Cp),
        transcendentals=0,
        bytes_accessed=(B * K * itemsize(x.dtype)
                        + B * Cp * itemsize(out_dtype)
                        + weight_bytes),
    )

    out = pl.pallas_call(
        mlp_kernel,
        out_shape=jax.ShapeDtypeStruct((B, Cp), out_dtype),
        grid=grid,
        in_specs=[
            tiled((TB, K)),                        # x: unpadded, cast in-kernel
            resident((K, H1p)), resident((1, H1p)),
            resident((H1p, H2p)), resident((1, H2p)),
            resident((H2p, Cp)), resident((1, Cp)),
        ],
        out_specs=tiled((TB, Cp)),
        compiler_params=pltpu.CompilerParams(
            dimension_semantics=("parallel",)),
        cost_estimate=cost,
    )(x, w1, b1, w2, b2, w3, b3)

    return out[:, :num_classes]


def init_params(key, input_dim, num_classes):
    """Deterministic synthetic parameters (same shapes as the nn.Linear
    layers), stored as (in, out) for the kernel."""
    k1, k2, k3, k4, k5, k6 = jax.random.split(key, 6)

    def lin(kw, kb, fan_in, fan_out):
        bound = 1.0 / jnp.sqrt(fan_in)
        w = jax.random.uniform(kw, (fan_in, fan_out), jnp.float32, -bound, bound)
        b = jax.random.uniform(kb, (1, fan_out), jnp.float32, -bound, bound)
        return w, b

    w1, b1 = lin(k1, k2, input_dim, 128)
    w2, b2 = lin(k3, k4, 128, 64)
    w3, b3 = lin(k5, k6, 64, num_classes)
    return {"w1": w1, "b1": b1, "w2": w2, "b2": b2, "w3": w3, "b3": b3}


def reference_forward(x, params, compute_dtype=jnp.float32):
    """Pure-JAX reference mirroring the kernel math (operands in
    compute_dtype, f32 accumulation)."""
    def dot(a, w):
        return jnp.dot(a.astype(compute_dtype), w.astype(compute_dtype),
                       preferred_element_type=jnp.float32)
    h1 = jnp.maximum(dot(x, params["w1"]) + params["b1"], 0.0)
    h2 = jnp.maximum(dot(h1, params["w2"]) + params["b2"], 0.0)
    return dot(h2, params["w3"]) + params["b3"]


if __name__ == "__main__":
    # ECAPA-TDNN embeddings are 192-dim; first-letter classes = 26.
    batch, input_dim, num_classes = 8, 192, 26

    key = jax.random.PRNGKey(0)
    kx, kp = jax.random.split(key)
    x = jax.random.normal(kx, (batch, input_dim), dtype=jnp.float32)
    raw_params = init_params(kp, input_dim, num_classes)
    prepared, C = prepare_params(raw_params)

    # f32-output path: tight check against a reference doing the same
    # bf16-operand / f32-accumulation math.
    out = jax.block_until_ready(
        first_letter_mlp_forward(x, prepared, num_classes=C,
                                 out_dtype=jnp.float32))
    assert out.shape == (batch, num_classes)
    ref_bf16 = reference_forward(x, raw_params, compute_dtype=jnp.bfloat16)
    assert jnp.allclose(out, ref_bf16, atol=2e-3, rtol=2e-3)

    # Loose sanity check against the pure-f32 PyTorch-equivalent forward.
    ref_f32 = reference_forward(x, raw_params, compute_dtype=jnp.float32)
    assert jnp.allclose(out, ref_f32, atol=5e-2, rtol=5e-2)

    # Default bf16-output path (halved writeback).
    out_bf16 = jax.block_until_ready(
        first_letter_mlp_forward(x, prepared, num_classes=C))
    assert out_bf16.shape == (batch, num_classes)
    assert out_bf16.dtype == jnp.bfloat16
    assert jnp.allclose(out_bf16.astype(jnp.float32), ref_bf16,
                        atol=3e-2, rtol=3e-2)

    # Multi-step grid with a partial boundary block (B not a tile multiple;
    # no batch padding in the wrapper).
    x2 = jax.random.normal(jax.random.PRNGKey(1), (300, input_dim),
                           dtype=jnp.float32)
    out2 = jax.block_until_ready(
        first_letter_mlp_forward(x2, prepared, num_classes=C,
                                 block_batch=128, out_dtype=jnp.float32))
    ref2 = reference_forward(x2, raw_params, compute_dtype=jnp.bfloat16)
    assert out2.shape == (300, num_classes)
    assert jnp.allclose(out2, ref2, atol=2e-3, rtol=2e-3)

    print("KERNEL_OK")
</pallas_src>

<mosaic_0001>
module attributes {stable_mosaic.version = 11 : i64} {
  func.func @mlp_kernel(%arg0: i32, %arg1: memref<8x192xf32, #tpu.memory_space<vmem>>, %arg2: memref<192x128xbf16, #tpu.memory_space<vmem>>, %arg3: memref<1x128xf32, #tpu.memory_space<vmem>>, %arg4: memref<128x128xbf16, #tpu.memory_space<vmem>>, %arg5: memref<1x128xf32, #tpu.memory_space<vmem>>, %arg6: memref<128x128xbf16, #tpu.memory_space<vmem>>, %arg7: memref<1x128xf32, #tpu.memory_space<vmem>>, %arg8: memref<8x128xf32, #tpu.memory_space<vmem>>) attributes {dimension_semantics = [#tpu.dimension_semantics<parallel>], iteration_bounds = array<i64: 1>, scalar_prefetch = 0 : i64, scratch_operands = 0 : i64, tpu.core_type = #tpu.core_type<tc>, window_params = [{transform_indices = @transform_0, window_bounds = array<i64: 8, 192>}, {pipeline_mode = #tpu.pipeline_mode<synchronous>, transform_indices = @transform_1, window_bounds = array<i64: 192, 128>}, {pipeline_mode = #tpu.pipeline_mode<synchronous>, transform_indices = @transform_2, window_bounds = array<i64: 1, 128>}, {pipeline_mode = #tpu.pipeline_mode<synchronous>, transform_indices = @transform_3, window_bounds = array<i64: 128, 128>}, {pipeline_mode = #tpu.pipeline_mode<synchronous>, transform_indices = @transform_4, window_bounds = array<i64: 1, 128>}, {pipeline_mode = #tpu.pipeline_mode<synchronous>, transform_indices = @transform_5, window_bounds = array<i64: 128, 128>}, {pipeline_mode = #tpu.pipeline_mode<synchronous>, transform_indices = @transform_6, window_bounds = array<i64: 1, 128>}, {transform_indices = @transform_7, window_bounds = array<i64: 8, 128>}]} {
    %c0 = arith.constant 0 : index
    %c0_0 = arith.constant 0 : index
    %0 = vector.load %arg1[%c0, %c0_0] : memref<8x192xf32, #tpu.memory_space<vmem>>, vector<8x192xf32>
    %1 = arith.truncf %0 : vector<8x192xf32> to vector<8x192xbf16>
    %c0_1 = arith.constant 0 : index
    %c0_2 = arith.constant 0 : index
    %2 = vector.load %arg2[%c0_1, %c0_2] : memref<192x128xbf16, #tpu.memory_space<vmem>>, vector<192x128xbf16>
    %cst = arith.constant dense<0.000000e+00> : vector<8x128xf32>
    %3 = tpu.matmul %1, %2, %cst {dimension_numbers = #tpu.dot_dimension_numbers<[1], [0], [0], [1], [0, 0, 1, 1], [], []>} : vector<8x192xbf16>, vector<192x128xbf16>, vector<8x128xf32> -> vector<8x128xf32>
    %c0_3 = arith.constant 0 : index
    %c0_4 = arith.constant 0 : index
    %4 = vector.load %arg3[%c0_3, %c0_4] : memref<1x128xf32, #tpu.memory_space<vmem>>, vector<1x128xf32>
    %5 = vector.broadcast %4 : vector<1x128xf32> to vector<8x128xf32>
    %6 = arith.addf %3, %5 : vector<8x128xf32>
    %cst_5 = arith.constant 0.000000e+00 : f32
    %7 = vector.broadcast %cst_5 : f32 to vector<8x128xf32>
    %8 = arith.maximumf %6, %7 : vector<8x128xf32>
    %9 = arith.truncf %8 : vector<8x128xf32> to vector<8x128xbf16>
    %c0_6 = arith.constant 0 : index
    %c0_7 = arith.constant 0 : index
    %10 = vector.load %arg4[%c0_6, %c0_7] : memref<128x128xbf16, #tpu.memory_space<vmem>>, vector<128x128xbf16>
    %cst_8 = arith.constant dense<0.000000e+00> : vector<8x128xf32>
    %11 = tpu.matmul %9, %10, %cst_8 {dimension_numbers = #tpu.dot_dimension_numbers<[1], [0], [0], [1], [0, 0, 1, 1], [], []>} : vector<8x128xbf16>, vector<128x128xbf16>, vector<8x128xf32> -> vector<8x128xf32>
    %c0_9 = arith.constant 0 : index
    %c0_10 = arith.constant 0 : index
    %12 = vector.load %arg5[%c0_9, %c0_10] : memref<1x128xf32, #tpu.memory_space<vmem>>, vector<1x128xf32>
    %13 = vector.broadcast %12 : vector<1x128xf32> to vector<8x128xf32>
    %14 = arith.addf %11, %13 : vector<8x128xf32>
    %cst_11 = arith.constant 0.000000e+00 : f32
    %15 = vector.broadcast %cst_11 : f32 to vector<8x128xf32>
    %16 = arith.maximumf %14, %15 : vector<8x128xf32>
    %17 = arith.truncf %16 : vector<8x128xf32> to vector<8x128xbf16>
    %c0_12 = arith.constant 0 : index
    %c0_13 = arith.constant 0 : index
    %18 = vector.load %arg6[%c0_12, %c0_13] : memref<128x128xbf16, #tpu.memory_space<vmem>>, vector<128x128xbf16>
    %cst_14 = arith.constant dense<0.000000e+00> : vector<8x128xf32>
    %19 = tpu.matmul %17, %18, %cst_14 {dimension_numbers = #tpu.dot_dimension_numbers<[1], [0], [0], [1], [0, 0, 1, 1], [], []>} : vector<8x128xbf16>, vector<128x128xbf16>, vector<8x128xf32> -> vector<8x128xf32>
    %c0_15 = arith.constant 0 : index
    %c0_16 = arith.constant 0 : index
    %20 = vector.load %arg7[%c0_15, %c0_16] : memref<1x128xf32, #tpu.memory_space<vmem>>, vector<1x128xf32>
    %21 = vector.broadcast %20 : vector<1x128xf32> to vector<8x128xf32>
    %22 = arith.addf %19, %21 : vector<8x128xf32>
    %c0_17 = arith.constant 0 : index
    %c0_18 = arith.constant 0 : index
    %23 = vector.load %arg8[%c0_17, %c0_18] : memref<8x128xf32, #tpu.memory_space<vmem>>, vector<8x128xf32>
    tpu.vector_store %arg8[%c0_17, %c0_18], %22 {strides = array<i32>} : memref<8x128xf32, #tpu.memory_space<vmem>>, vector<8x128xf32>,
    return
  }
  func.func @transform_0(%arg0: i32) -> (i32, i32) {
    %c0_i32 = arith.constant 0 : i32
    %c0_i32_0 = arith.constant 0 : i32
    return %arg0, %c0_i32 : i32, i32
  }
  func.func @transform_1(%arg0: i32) -> (i32, i32) {
    %c0_i32 = arith.constant 0 : i32
    %c0_i32_0 = arith.constant 0 : i32
    %c0_i32_1 = arith.constant 0 : i32
    return %c0_i32, %c0_i32_0 : i32, i32
  }
  func.func @transform_2(%arg0: i32) -> (i32, i32) {
    %c0_i32 = arith.constant 0 : i32
    %c0_i32_0 = arith.constant 0 : i32
    %c0_i32_1 = arith.constant 0 : i32
    return %c0_i32, %c0_i32_0 : i32, i32
  }
  func.func @transform_3(%arg0: i32) -> (i32, i32) {
    %c0_i32 = arith.constant 0 : i32
    %c0_i32_0 = arith.constant 0 : i32
    %c0_i32_1 = arith.constant 0 : i32
    return %c0_i32, %c0_i32_0 : i32, i32
  }
  func.func @transform_4(%arg0: i32) -> (i32, i32) {
    %c0_i32 = arith.constant 0 : i32
    %c0_i32_0 = arith.constant 0 : i32
    %c0_i32_1 = arith.constant 0 : i32
    return %c0_i32, %c0_i32_0 : i32, i32
  }
  func.func @transform_5(%arg0: i32) -> (i32, i32) {
    %c0_i32 = arith.constant 0 : i32
    %c0_i32_0 = arith.constant 0 : i32
    %c0_i32_1 = arith.constant 0 : i32
    return %c0_i32, %c0_i32_0 : i32, i32
  }
  func.func @transform_6(%arg0: i32) -> (i32, i32) {
    %c0_i32 = arith.constant 0 : i32
    %c0_i32_0 = arith.constant 0 : i32
    %c0_i32_1 = arith.constant 0 : i32
    return %c0_i32, %c0_i32_0 : i32, i32
  }
  func.func @transform_7(%arg0: i32) -> (i32, i32) {
    %c0_i32 = arith.constant 0 : i32
    %c0_i32_0 = arith.constant 0 : i32
    return %arg0, %c0_i32 : i32, i32
  }
}

</mosaic_0001>

<bundles_post_ra>
// kernel: first_letter_mlp_forward.1
= control target key start
LH: loop header
LB: loop body
LE: loop exit
PB: predicated region body
PF: predicated region fallthrough
CT: control target
= control target key end

     0   :  { %12 = vsyncpa [#allocation3], 0  ;;  %s868_s0 = inlined_call_operand.hbm [shape: f32[8,192], index: 0, kind: input, shape index: {}]   ;;  %s869_s1 = inlined_call_operand.hbm [shape: bf16[192,128], index: 1, kind: input, shape index: {}]   ;;  %s870_s2 = inlined_call_operand.vmem [shape: f32[1,128], index: 2, kind: input, shape index: {}]   ;;  %s871_s3 = inlined_call_operand.hbm [shape: bf16[128,128], index: 3, kind: input, shape index: {}]   ;;  %s872_s4 = inlined_call_operand.vmem [shape: f32[1,128], index: 4, kind: input, shape index: {}]   ;;  %s873_s5 = inlined_call_operand.hbm [shape: bf16[128,128], index: 5, kind: input, shape index: {}]   ;;  %s874_s6 = inlined_call_operand.vmem [shape: f32[1,128], index: 6, kind: input, shape index: {}]   ;;  %s875_s7 = inlined_call_operand.hbm [shape: f32[8,128], index: 7, kind: output, shape index: {}]  }
   0x1   :  { %13 = vsyncpa [#allocation6], 0 }
   0x2   :  { %14 = vsyncpa [#allocation9], 0 }
   0x3   :  { %15 = vsyncpa [#allocation4], 0  ;;  %s722_s24 = smov [#allocation5]   ;;  %s604_s28 = scalar_lea.hbm %s869_s1, 1536 }
   0x4   :  { %s31_s25 = sshll.u32 %s722_s24, 4  ;;  %p605_p0 = scmp.ne.s32.totalorder %s869_s1, %s604_s28  ;;  %s32_s25 = int_to_ptr.vmem [resolvable:$true] %s31_s25 }
   0x5   :  { %p608_p1 = scmp.lt.u32.totalorder %s604_s28, %s869_s1 }
   0x7   :  { %p610_p2 = pnand %p608_p1, %p605_p0 }
   0x9   :  { %613 = shalt.err (!%p610_p2)
}
   0xa   :  { %s614_s10 = scalar_lea.vmem %s32_s25, 1536  ;;  %p619_p4 = scmp.lt.s32.totalorder %s32_s25, %s32_s25 }
   0xb   :  { %p615_p3 = scmp.ne.s32.totalorder %s32_s25, %s614_s10  ;;  %p620_p5 = scmp.lt.s32.totalorder %s614_s10, %s614_s10 }
   0xd   :  { %p621_p6 = por %p620_p5, %p619_p4 }
   0xf   :  { %p622_p7 = pnand %p621_p6, %p615_p3 }
  0x11   :  { %625 = shalt.err (!%p622_p7)
}
  0x12   :  { %s723_s11 = smov 64   ;;  %s724_s12 = smov 4  }
  0x13   :  { %37 = dma.hbm_to_vmem [thread:$0]  %s869_s1, 1536, %s32_s25, [#allocation6], %s723_s11, %s723_s11, %s724_s12  }
  0x14   :  { %s725_s15 = smov [#allocation2]   ;;  %s726_s17 = smov [#allocation7]  }
  0x15   :  { %s22_s16 = sshll.u32 %s725_s15, 4  ;;  %s45_s18 = sshll.u32 %s726_s17, 4  ;;  %s23_s16 = int_to_ptr.vmem [resolvable:$true] %s22_s16  ;;  %s46_s18 = int_to_ptr.vmem [resolvable:$true] %s45_s18 }
  0x16   :  { %s626_s21 = scalar_lea.hbm %s868_s0, 256 }
  0x17   :  { %p627_p8 = scmp.ne.s32.totalorder %s868_s0, %s626_s21  ;;  %p630_p9 = scmp.lt.u32.totalorder %s626_s21, %s868_s0 }
  0x19   :  { %p632_p10 = pnand %p630_p9, %p627_p8 }
  0x1b   :  { %635 = shalt.err (!%p632_p10)
}
  0x1c   :  { %s636_s1 = scalar_lea.vmem %s23_s16, 256  ;;  %p641_p12 = scmp.lt.s32.totalorder %s23_s16, %s23_s16 }
  0x1d   :  { %p637_p11 = scmp.ne.s32.totalorder %s23_s16, %s636_s1  ;;  %p642_p13 = scmp.lt.s32.totalorder %s636_s1, %s636_s1 }
  0x1f   :  { %p643_p0 = por %p642_p13, %p641_p12 }
  0x21   :  { %p644_p1 = pnand %p643_p0, %p637_p11 }
  0x23   :  { %647 = shalt.err (!%p644_p1)
}
  0x24   :  { %25 = dma.hbm_to_vmem [thread:$0]  %s868_s0, 256, %s23_s16, [#allocation3]  }
  0x25   :  { %s648_s30 = scalar_lea.hbm %s871_s3, 1024 }
  0x26   :  { %p649_p2 = scmp.ne.s32.totalorder %s871_s3, %s648_s30  ;;  %p652_p3 = scmp.lt.u32.totalorder %s648_s30, %s871_s3 }
  0x28   :  { %p654_p4 = pnand %p652_p3, %p649_p2 }
  0x2a   :  { %657 = shalt.err (!%p654_p4)
}
  0x2b   :  { %s658_s14 = scalar_lea.vmem %s46_s18, 1024  ;;  %p663_p6 = scmp.lt.s32.totalorder %s46_s18, %s46_s18 }
  0x2c   :  { %p659_p5 = scmp.ne.s32.totalorder %s46_s18, %s658_s14  ;;  %p664_p7 = scmp.lt.s32.totalorder %s658_s14, %s658_s14 }
  0x2e   :  { %p665_p8 = por %p664_p7, %p663_p6 }
  0x30   :  { %p666_p9 = pnand %p665_p8, %p659_p5 }
  0x32   :  { %669 = shalt.err (!%p666_p9)
}
  0x33   :  { %51 = dma.hbm_to_vmem [thread:$0]  %s871_s3, 1024, %s46_s18, [#allocation6], %s723_s11, %s723_s11, %s724_s12  }
  0x34   :  { %s727_s16 = smov [#allocation8]   ;;  %s670_s21 = scalar_lea.hbm %s873_s5, 1024 }
  0x35   :  { %s59_s17 = sshll.u32 %s727_s16, 4  ;;  %p671_p10 = scmp.ne.s32.totalorder %s873_s5, %s670_s21  ;;  %s60_s17 = int_to_ptr.vmem [resolvable:$true] %s59_s17 }
  0x36   :  { %p674_p11 = scmp.lt.u32.totalorder %s670_s21, %s873_s5 }
  0x38   :  { %p676_p12 = pnand %p674_p11, %p671_p10 }
  0x3a   :  { %679 = shalt.err (!%p676_p12)
}
  0x3b   :  { %s680_s1 = scalar_lea.vmem %s60_s17, 1024  ;;  %p685_p0 = scmp.lt.s32.totalorder %s60_s17, %s60_s17 }
  0x3c   :  { %p681_p13 = scmp.ne.s32.totalorder %s60_s17, %s680_s1  ;;  %p686_p1 = scmp.lt.s32.totalorder %s680_s1, %s680_s1 }
  0x3e   :  { %p687_p2 = por %p686_p1, %p685_p0 }
  0x40   :  { %p688_p3 = pnand %p687_p2, %p681_p13 }
  0x42   :  { %691 = shalt.err (!%p688_p3)
}
  0x43   :  { %65 = dma.hbm_to_vmem [thread:$0]  %s873_s5, 1024, %s60_s17, [#allocation9], %s723_s11, %s723_s11, %s724_s12  }
  0x44   :  { %714 = dma.done.wait [#allocation3], 256  }
  0x45   :  { %715 = vsyncadd [#allocation3], 4294967040 }
  0x46   :  { %716 = dma.done.wait [#allocation6], 2560  }
  0x47   :  { %717 = vsyncadd [#allocation6], 4294964736 }
  0x48   :  { %718 = dma.done.wait [#allocation9], 1024  }
  0x49   :  { %719 = vsyncadd [#allocation9], 4294966272  ;;  %v728_v0 = vmov 0   ;;  %v729_v1 = vmov 0.0   ;;  %v576_v2 = vld [vmem:[#allocation5] sm:$0xff]   ;;  %v577_v3 = vld [vmem:[#allocation5 + $0x8] sm:$0xff]  }
  0x4a   :  { %192 = vmatprep.subr.bf16.mxu0 %v728_v0  ;;  %526 = vmatprep.subr.bf16.mxu1 %v729_v1  ;;  %v578_v4 = vld [vmem:[#allocation5 + $0x10] sm:$0xff]   ;;  %v579_v5 = vld [vmem:[#allocation5 + $0x18] sm:$0xff]   ;;  %vm188_vm0 = vcmask 523264   ;;  %v588_v8 = vld [vmem:[#allocation7] sm:$0xff]   ;;  %vm730_vm1 = vmmov 0   ;;  %s731_s28 = smov [#allocation10]  }
  0x4b   :  { %193 = vmatpush1.bf16.msra.mxu0 %v576_v2  ;;  %v82_v6 = vld [vmem:[#allocation2 + $0x8] sm:$0xff]  ;;  %v580_v9 = vld [vmem:[#allocation5 + $0x20] sm:$0xff]   ;;  %527 = vmatpush3.bf16.msra.mxu1 %v588_v8  ;;  %v589_v10 = vld [vmem:[#allocation7 + $0x8] sm:$0xff]   ;;  %s465_s29 = sshll.u32 %s731_s28, 4  ;;  %s466_s29 = int_to_ptr.vmem [resolvable:$true] %s465_s29 }
  0x4c   :  { %194 = vmatprep.subr.bf16.mxu0 %v728_v0  ;;  %v84_v7 = vpack.c.bf16 %v82_v6, %v82_v6  ;;  %528 = vmatprep.subr.bf16.mxu1 %v729_v1  ;;  %v581_v11 = vld [vmem:[#allocation5 + $0x28] sm:$0xff]   ;;  %v590_v12 = vld [vmem:[#allocation7 + $0x10] sm:$0xff]   ;;  %v591_v14 = vld [vmem:[#allocation7 + $0x18] sm:$0xff]   ;;  %p697_p5 = scmp.lt.s32.totalorder %s466_s29, %s466_s29 }
  0x4d   :  { %v582_v13 = vld [vmem:[#allocation5 + $0x30] sm:$0xff]   ;;  %v583_v15 = vld [vmem:[#allocation5 + $0x38] sm:$0xff]   ;;  %v592_v16 = vld [vmem:[#allocation7 + $0x20] sm:$0xff]   ;;  %542 = vmatprep.mubr.msk.bf16.mxu1 %vm730_vm1, %v729_v1 }
  0x4e   :  { %489 = vmatprep.mubr.msk.bf16.mxu0 %vm188_vm0, %v84_v7  ;;  %v584_v17 = vld [vmem:[#allocation5 + $0x40] sm:$0xff]   ;;  %v593_v18 = vld [vmem:[#allocation7 + $0x28] sm:$0xff]   ;;  %v586_v20 = vld [vmem:[#allocation5 + $0x50] sm:$0xff]  }
  0x4f   :  { %195 = vmatpush1.bf16.msra.mxu0 %v577_v3  ;;  %529 = vmatpush3.bf16.msra.mxu1 %v589_v10  ;;  %v585_v19 = vld [vmem:[#allocation5 + $0x48] sm:$0xff]   ;;  %v587_v21 = vld [vmem:[#allocation5 + $0x58] sm:$0xff]   ;;  %v81_v22 = vld [vmem:[#allocation2] sm:$0xff] }
  0x50   :  { %196 = vmatprep.subr.bf16.mxu0 %v728_v0  ;;  %530 = vmatprep.subr.bf16.mxu1 %v729_v1  ;;  %v83_v23 = vpack.c.bf16 %v81_v22, %v81_v22  ;;  %v594_v24 = vld [vmem:[#allocation7 + $0x30] sm:$0xff]   ;;  %v595_v25 = vld [vmem:[#allocation7 + $0x38] sm:$0xff]   ;;  %v596_v33 = vld [vmem:[#allocation8] sm:$0xff]  }
  0x51   :  { %v476_v26 = vld [vmem:[%s870_s2] ss:$0 sm:$0xff]  ;;  %v597_v35 = vld [vmem:[#allocation8 + $0x8] sm:$0xff]   ;;  %v599_v37 = vld [vmem:[#allocation8 + $0x18] sm:$0xff]  }
  0x52   :  { %v598_v36 = vld [vmem:[#allocation8 + $0x10] sm:$0xff]   ;;  %v600_v38 = vld [vmem:[#allocation8 + $0x20] sm:$0xff]   ;;  %v601_v39 = vld [vmem:[#allocation8 + $0x28] sm:$0xff]  }
  0x53   :  { %197 = vmatpush1.bf16.msra.mxu0 %v578_v4  ;;  %531 = vmatpush3.bf16.msra.mxu1 %v590_v12  ;;  %v602_v40 = vld [vmem:[#allocation8 + $0x30] sm:$0xff]   ;;  %v603_v41 = vld [vmem:[#allocation8 + $0x38] sm:$0xff]  }
  0x54   :  { %198 = vmatprep.subr.bf16.mxu0 %v728_v0  ;;  %532 = vmatprep.subr.bf16.mxu1 %v729_v1  ;;  %v490_v42 = vld [vmem:[%s872_s4] ss:$0 sm:$0xff]  ;;  %s692_s4 = scalar_lea.vmem %s466_s29, 128 }
  0x55   :  { %v499_v50 = vld [vmem:[%s874_s6] ss:$0 sm:$0xff]  ;;  %p693_p4 = scmp.ne.s32.totalorder %s466_s29, %s692_s4  ;;  %p698_p6 = scmp.lt.s32.totalorder %s692_s4, %s692_s4 }
  0x57   :  { %199 = vmatpush1.bf16.msra.mxu0 %v579_v5  ;;  %533 = vmatpush3.bf16.msra.mxu1 %v591_v14  ;;  %p699_p7 = por %p698_p6, %p697_p5 }
  0x58   :  { %200 = vmatprep.subr.bf16.mxu0 %v728_v0  ;;  %534 = vmatprep.subr.bf16.mxu1 %v729_v1 }
  0x59   :  { %p700_p8 = pnand %p699_p7, %p693_p4 }
  0x5b   :  { %201 = vmatpush1.bf16.msra.mxu0 %v580_v9  ;;  %535 = vmatpush3.bf16.msra.mxu1 %v592_v16 }
  0x5c   :  { %202 = vmatprep.subr.bf16.mxu0 %v728_v0  ;;  %536 = vmatprep.subr.bf16.mxu1 %v729_v1 }
  0x5f   :  { %203 = vmatpush1.bf16.msra.mxu0 %v581_v11  ;;  %537 = vmatpush3.bf16.msra.mxu1 %v593_v18 }
  0x60   :  { %204 = vmatprep.subr.bf16.mxu0 %v728_v0  ;;  %538 = vmatprep.subr.bf16.mxu1 %v729_v1 }
  0x63   :  { %205 = vmatpush1.bf16.msra.mxu0 %v582_v13  ;;  %539 = vmatpush3.bf16.msra.mxu1 %v594_v24 }
  0x64   :  { %206 = vmatprep.subr.bf16.mxu0 %v728_v0  ;;  %540 = vmatprep.subr.bf16.mxu1 %v729_v1 }
  0x67   :  { %207 = vmatpush1.bf16.msra.mxu0 %v583_v15  ;;  %541 = vmatpush3.bf16.msra.mxu1 %v595_v25 }
  0x68   :  { %208 = vmatprep.subr.bf16.mxu0 %v728_v0  ;;  %546 = vmatprep.subr.bf16.mxu1 %v729_v1 }
  0x6b   :  { %209 = vmatpush1.bf16.msra.mxu0 %v584_v17 }
  0x6c   :  { %210 = vmatprep.subr.bf16.mxu0 %v728_v0 }
  0x6f   :  { %211 = vmatpush1.bf16.msra.mxu0 %v585_v19 }
  0x70   :  { %212 = vmatprep.subr.bf16.mxu0 %v728_v0 }
  0x73   :  { %213 = vmatpush1.bf16.msra.mxu0 %v586_v20 }
  0x74   :  { %214 = vmatprep.subr.bf16.mxu0 %v728_v0 }
  0x77   :  { %215 = vmatpush1.bf16.msra.mxu0 %v587_v21 }
  0x7a   :  { %225 = vmatmul.mubr.bf16.vlgmr.msra.gmra.mrb[0].mxu0 %v83_v23 }
 0x14d   :  { %v226_v27 = vpop.f32.mrb[0].mxu0 }
 0x14e   :  { %v227_v28 = vadd.f32 %v476_v26, %v226_v27  ;;  %v228_v29 = vpop.f32.mrb[1].mxu0 }
 0x14f   :  { %v229_v30 = vpop.f32.mrb[2].mxu0 }
 0x150   :  { %v232_v31 = vmax.f32 %v227_v28, 0.0  ;;  %v230_v32 = vpop.f32.mrb[3].mxu0 }
 0x152   :  { %v233_v34 = vpack.c.bf16 %v232_v31, %v232_v31 }
 0x154   :  { %543 = vmatmul.mubr.bf16.vlgmr.msra.gmra.mrb[0].mxu1 %v233_v34 }
 0x155   :  { %547 = vmatpush3.bf16.msra.mxu1 %v596_v33  ;;  %562 = vmatprep.mubr.msk.bf16.mxu1 %vm730_vm1, %v729_v1 }
 0x156   :  { %548 = vmatprep.subr.bf16.mxu1 %v729_v1 }
 0x159   :  { %549 = vmatpush3.bf16.msra.mxu1 %v597_v35 }
 0x15a   :  { %550 = vmatprep.subr.bf16.mxu1 %v729_v1 }
 0x15d   :  { %551 = vmatpush3.bf16.msra.mxu1 %v598_v36 }
 0x15e   :  { %552 = vmatprep.subr.bf16.mxu1 %v729_v1 }
 0x161   :  { %553 = vmatpush3.bf16.msra.mxu1 %v599_v37 }
 0x162   :  { %554 = vmatprep.subr.bf16.mxu1 %v729_v1 }
 0x165   :  { %555 = vmatpush3.bf16.msra.mxu1 %v600_v38 }
 0x166   :  { %556 = vmatprep.subr.bf16.mxu1 %v729_v1 }
 0x169   :  { %557 = vmatpush3.bf16.msra.mxu1 %v601_v39 }
 0x16a   :  { %558 = vmatprep.subr.bf16.mxu1 %v729_v1 }
 0x16d   :  { %559 = vmatpush3.bf16.msra.mxu1 %v602_v40 }
 0x16e   :  { %560 = vmatprep.subr.bf16.mxu1 %v729_v1 }
 0x171   :  { %561 = vmatpush3.bf16.msra.mxu1 %v603_v41 }
 0x227   :  { %v339_v43 = vpop.f32.mrb[0].mxu1 }
 0x228   :  { %v340_v44 = vadd.f32 %v490_v42, %v339_v43  ;;  %v544_v45 = vpop.f32.mrb[1].mxu1 }
 0x229   :  { %v342_v46 = vpop.f32.mrb[2].mxu1 }
 0x22a   :  { %v345_v47 = vmax.f32 %v340_v44, 0.0  ;;  %v545_v48 = vpop.f32.mrb[3].mxu1 }
 0x22c   :  { %v346_v49 = vpack.c.bf16 %v345_v47, %v345_v47 }
 0x22e   :  { %563 = vmatmul.mubr.bf16.vlgmr.msra.gmra.mrb[4].mxu1 %v346_v49 }
 0x301   :  { %v452_v51 = vpop.f32.mrb[4].mxu1 }
 0x302   :  { %v453_v52 = vadd.f32 %v499_v50, %v452_v51  ;;  %v564_v53 = vpop.f32.mrb[5].mxu1 }
 0x303   :  { %v455_v54 = vpop.f32.mrb[6].mxu1 }
 0x304   :  { %458 = vst [vmem:[#allocation10] sm:$0xff] %v453_v52  ;;  %v565_v55 = vpop.f32.mrb[7].mxu1 }
 0x305   :  { %703 = shalt.err (!%p700_p8)
}
 0x306   :  { %s704_s6 = scalar_lea.hbm %s875_s7, 128 }
 0x307   :  { %p705_p9 = scmp.ne.s32.totalorder %s875_s7, %s704_s6  ;;  %p708_p10 = scmp.lt.u32.totalorder %s704_s6, %s875_s7 }
 0x309   :  { %p710_p11 = pnand %p708_p10, %p705_p9 }
 0x30b   :  { %713 = shalt.err (!%p710_p11)
}
 0x30c   :  { %468 = dma.vmem_to_hbm [thread:$0]  %s466_s29, 128, %s875_s7, [#allocation4]  }
 0x30d   :  { %720 = dma.done.wait [#allocation4], 128  }
 0x30e   :  { %721 = vsyncadd [#allocation4], 4294967168 }
 0x30f   :  { %472 = vsyncpa [#allocation3], 1 }
 0x310   :  { %473 = vsyncpa [#allocation6], 1 }
 0x311   :  { %474 = vsyncpa [#allocation9], 1 }
 0x312   :  { %475 = vsyncpa [#allocation4], 1 }

</bundles_post_ra>
